<compile_context>
chip_gen: v6e
topology: v6e:2x2x1
jax: 0.10.0
libtpu: 0.0.40
codegen_flags: <defaults>
</compile_context>

<pallas_src>
from functools import partial

import jax
import jax.numpy as jnp
from jax.experimental import pallas as pl
from jax.experimental.pallas import tpu as pltpu


def _round_up(n, m):
    return ((n + m - 1) // m) * m


# Keep the resident fused weight well under v7x's 64 MiB physical VMEM,
# leaving room for x / output double-buffers and the bias.
_WEIGHT_VMEM_BUDGET = 24 << 20


def _choose_k_tile(F, Cp, w_itemsize, force_k_tile):
    """Full F (resident weight) when it fits; otherwise a K tile that divides
    F exactly (a clipped boundary K block would accumulate garbage)."""
    if force_k_tile:
        assert F % force_k_tile == 0, "forced K tile must divide n_features"
        return int(force_k_tile)
    if F * Cp * w_itemsize <= _WEIGHT_VMEM_BUDGET:
        return F
    for tk in (2048, 1024, 512, 256, 128):
        if F % tk == 0 and tk * Cp * w_itemsize <= _WEIGHT_VMEM_BUDGET:
            return tk
    # TODO(synk): huge fused weight with n_features not a multiple of 128 —
    # masked K-tiling not implemented; fall back to a fully resident weight.
    return F


def _make_resident_spec(block_shape, index_map):
    """BlockSpec for an operand whose block never changes across the grid:
    single-buffer it (halves its VMEM footprint).  Falls back gracefully if
    this JAX version does not expose pipeline_mode / Buffered."""
    try:
        return pl.BlockSpec(block_shape, index_map, pipeline_mode=pl.Buffered(1))
    except (AttributeError, TypeError):
        return pl.BlockSpec(block_shape, index_map)


def _fused_heads_resident_kernel(x_ref, w_ref, b_ref, o_ref):
    # x: [TB, F] (input dtype), w: [F, Cp] bf16 (resident), b: [1, Cp] f32.
    acc = jnp.dot(x_ref[...].astype(w_ref.dtype), w_ref[...],
                  preferred_element_type=jnp.float32)
    o_ref[...] = (acc + b_ref[...]).astype(o_ref.dtype)


def _fused_heads_ktiled_kernel(x_ref, w_ref, b_ref, o_ref, acc_ref):
    # x: [TB, TK], w: [TK, Cp] (streamed over k), acc: [TB, Cp] f32 scratch.
    k = pl.program_id(1)

    @pl.when(k == 0)
    def _():
        acc_ref[...] = jnp.zeros_like(acc_ref)

    acc_ref[...] += jnp.dot(x_ref[...].astype(w_ref.dtype), w_ref[...],
                            preferred_element_type=jnp.float32)

    @pl.when(k == pl.num_programs(1) - 1)
    def _():
        o_ref[...] = (acc_ref[...] + b_ref[...]).astype(o_ref.dtype)


@partial(jax.jit, static_argnames=("force_k_tile",))
def _fused_heads_pallas(x, w, b, *, force_k_tile=0):
    B, F = x.shape
    Fw, Cp = w.shape
    assert F == Fw
    assert Cp % 128 == 0  # fused class axis padded at construction

    out_dtype = x.dtype
    x_isz = jnp.dtype(x.dtype).itemsize
    w_isz = jnp.dtype(w.dtype).itemsize
    o_isz = jnp.dtype(out_dtype).itemsize

    # ---- Batch tiling: no host-side pad / slice; Pallas clips the last tile.
    B8 = _round_up(max(B, 1), 8)
    if B8 <= 512:
        TB = B8
    else:
        # Minimize wasted rows in the last (clipped) tile; prefer larger tiles.
        TB = min((512, 448, 384, 320, 256),
                 key=lambda t: (_round_up(B8, t), -t))
    num_b = pl.cdiv(B, TB)

    # ---- K (feature) tiling only if the fused weight can't stay resident.
    TK = _choose_k_tile(F, Cp, w_isz, force_k_tile)
    k_tiled = TK < F
    num_k = F // TK if k_tiled else 1

    # ---- VMEM budget -> explicit scoped-VMEM limit (v5e default is 16 MiB).
    w_bufs = 2 if k_tiled else 1
    vmem_needed = (2 * TB * TK * x_isz            # double-buffered x tiles
                   + w_bufs * TK * Cp * w_isz     # weight (resident or streamed)
                   + 2 * Cp * 4                   # bias
                   + 2 * TB * Cp * o_isz          # double-buffered output tile
                   + (TB * Cp * 4 if k_tiled else 0))  # f32 accumulator
    vmem_limit = int(min(max(vmem_needed * 5 // 4 + (2 << 20), 32 << 20),
                         64 << 20))

    cost = pl.CostEstimate(
        flops=2 * B * F * Cp,
        transcendentals=0,
        bytes_accessed=int(B * F * x_isz + F * Cp * w_isz + Cp * 4
                           + B * Cp * o_isz),
    )

    if not k_tiled:
        grid = (num_b,)
        in_specs = [
            pl.BlockSpec((TB, F), lambda i: (i, 0)),              # x batch tile
            _make_resident_spec((F, Cp), lambda i: (0, 0)),       # fused weight
            _make_resident_spec((1, Cp), lambda i: (0, 0)),       # fused bias
        ]
        out_specs = pl.BlockSpec((TB, Cp), lambda i: (i, 0))
        scratch_shapes = []
        kernel = _fused_heads_resident_kernel
        dims = ("parallel",)
    else:
        grid = (num_b, num_k)
        in_specs = [
            pl.BlockSpec((TB, TK), lambda i, k: (i, k)),          # x batch/K tile
            pl.BlockSpec((TK, Cp), lambda i, k: (k, 0)),          # streamed weight
            _make_resident_spec((1, Cp), lambda i, k: (0, 0)),    # fused bias
        ]
        out_specs = pl.BlockSpec((TB, Cp), lambda i, k: (i, 0))
        scratch_shapes = [pltpu.VMEM((TB, Cp), jnp.float32)]
        kernel = _fused_heads_ktiled_kernel
        dims = ("parallel", "arbitrary")

    return pl.pallas_call(
        kernel,
        out_shape=jax.ShapeDtypeStruct((B, Cp), out_dtype),
        grid_spec=pltpu.PrefetchScalarGridSpec(
            num_scalar_prefetch=0,
            grid=grid,
            in_specs=in_specs,
            out_specs=out_specs,
            scratch_shapes=scratch_shapes,
        ),
        compiler_params=pltpu.CompilerParams(
            dimension_semantics=dims,
            vmem_limit_bytes=vmem_limit,
        ),
        cost_estimate=cost,
    )(x, w, b)


class MultiTaskHeadPallas:
    """JAX/Pallas equivalent of the PyTorch MultiTaskHead module."""

    def __init__(self, n_features, n_classes_list, key,
                 compute_dtype=jnp.bfloat16, _force_k_tile=0):
        self.n_features = n_features
        self.n_classes_list = list(n_classes_list)
        self.compute_dtype = compute_dtype
        self._force_k_tile = _force_k_tile

        # Per-head params (PyTorch nn.Linear default init range), kept in f32
        # and in the transposed [F, C] layout.
        bound = 1.0 / (n_features ** 0.5)
        self.params = []
        for n_classes in self.n_classes_list:
            key, kw, kb = jax.random.split(key, 3)
            w = jax.random.uniform(
                kw, (n_features, n_classes), jnp.float32, -bound, bound)
            b = jax.random.uniform(kb, (n_classes,), jnp.float32, -bound, bound)
            self.params.append((w, b))

        # Fuse all heads once: [F, sum(C)] weight (cast to bf16 — native MXU
        # dtype, half the VMEM) and [1, sum(C)] f32 bias, both zero-padded so
        # the class axis is a multiple of 128 (lane-dense output stores).
        c_total = sum(self.n_classes_list)
        c_pad = max(_round_up(c_total, 128), 128)
        w_fused = jnp.concatenate([w for w, _ in self.params], axis=1)
        b_fused = jnp.concatenate([b for _, b in self.params], axis=0)
        self.w_fused = jnp.pad(
            w_fused, ((0, 0), (0, c_pad - c_total))).astype(compute_dtype)
        self.b_fused = jnp.pad(
            b_fused, (0, c_pad - c_total)).reshape(1, c_pad).astype(jnp.float32)

        self.offsets = []
        off = 0
        for c in self.n_classes_list:
            self.offsets.append(off)
            off += c

    def __call__(self, x):
        fused = _fused_heads_pallas(x, self.w_fused, self.b_fused,
                                    force_k_tile=self._force_k_tile)
        # Per-head views of the fused output slab (matches torch's list).
        return [fused[:, o:o + c]
                for o, c in zip(self.offsets, self.n_classes_list)]


if __name__ == "__main__":
    key = jax.random.PRNGKey(0)
    key, kx, kp = jax.random.split(key, 3)

    batch, n_features = 8, 32
    n_classes_list = [16, 8, 4]
    x = jax.random.normal(kx, (batch, n_features), jnp.float32)

    model = MultiTaskHeadPallas(n_features, n_classes_list, kp)
    outs = model(x)
    outs = [jax.block_until_ready(o) for o in outs]

    # References: exact bf16-operand / f32-accumulate linear (what the kernel
    # computes) and a looser check against the pure-f32 linear.
    xb = x.astype(jnp.bfloat16).astype(jnp.float32)
    for (w, b), o, c in zip(model.params, outs, n_classes_list):
        assert o.shape == (batch, c)
        wb = w.astype(jnp.bfloat16).astype(jnp.float32)
        assert jnp.allclose(o, xb @ wb + b, atol=1e-3, rtol=1e-3)
        assert jnp.allclose(o, x @ w + b, atol=3e-2, rtol=3e-2)

    # Also exercise the K-tiled (streamed-weight) path at a small shape.
    key, kx2, kp2 = jax.random.split(key, 3)
    x2 = jax.random.normal(kx2, (16, 256), jnp.float32)
    model2 = MultiTaskHeadPallas(256, [10, 6], kp2, _force_k_tile=128)
    outs2 = [jax.block_until_ready(o) for o in model2(x2)]
    x2b = x2.astype(jnp.bfloat16).astype(jnp.float32)
    for (w, b), o, c in zip(model2.params, outs2, [10, 6]):
        assert o.shape == (16, c)
        wb = w.astype(jnp.bfloat16).astype(jnp.float32)
        assert jnp.allclose(o, x2b @ wb + b, atol=1e-3, rtol=1e-3)

    print("KERNEL_OK")
</pallas_src>

<mosaic_0001>
module attributes {stable_mosaic.version = 11 : i64} {
  func.func @_fused_heads_resident_kernel(%arg0: i32, %arg1: memref<8x32xf32, #tpu.memory_space<vmem>>, %arg2: memref<32x128xbf16, #tpu.memory_space<vmem>>, %arg3: memref<1x128xf32, #tpu.memory_space<vmem>>, %arg4: memref<8x128xf32, #tpu.memory_space<vmem>>) attributes {dimension_semantics = [#tpu.dimension_semantics<parallel>], iteration_bounds = array<i64: 1>, scalar_prefetch = 0 : i64, scratch_operands = 0 : i64, tpu.core_type = #tpu.core_type<tc>, window_params = [{transform_indices = @transform_0, window_bounds = array<i64: 8, 32>}, {pipeline_mode = #tpu.pipeline_mode<synchronous>, transform_indices = @transform_1, window_bounds = array<i64: 32, 128>}, {pipeline_mode = #tpu.pipeline_mode<synchronous>, transform_indices = @transform_2, window_bounds = array<i64: 1, 128>}, {transform_indices = @transform_3, window_bounds = array<i64: 8, 128>}]} {
    %c0 = arith.constant 0 : index
    %c0_0 = arith.constant 0 : index
    %0 = vector.load %arg1[%c0, %c0_0] : memref<8x32xf32, #tpu.memory_space<vmem>>, vector<8x32xf32>
    %1 = arith.truncf %0 : vector<8x32xf32> to vector<8x32xbf16>
    %c0_1 = arith.constant 0 : index
    %c0_2 = arith.constant 0 : index
    %2 = vector.load %arg2[%c0_1, %c0_2] : memref<32x128xbf16, #tpu.memory_space<vmem>>, vector<32x128xbf16>
    %cst = arith.constant dense<0.000000e+00> : vector<8x128xf32>
    %3 = tpu.matmul %1, %2, %cst {dimension_numbers = #tpu.dot_dimension_numbers<[1], [0], [0], [1], [0, 0, 1, 1], [], []>} : vector<8x32xbf16>, vector<32x128xbf16>, vector<8x128xf32> -> vector<8x128xf32>
    %c0_3 = arith.constant 0 : index
    %c0_4 = arith.constant 0 : index
    %4 = vector.load %arg3[%c0_3, %c0_4] : memref<1x128xf32, #tpu.memory_space<vmem>>, vector<1x128xf32>
    %5 = vector.broadcast %4 : vector<1x128xf32> to vector<8x128xf32>
    %6 = arith.addf %3, %5 : vector<8x128xf32>
    %c0_5 = arith.constant 0 : index
    %c0_6 = arith.constant 0 : index
    %7 = vector.load %arg4[%c0_5, %c0_6] : memref<8x128xf32, #tpu.memory_space<vmem>>, vector<8x128xf32>
    tpu.vector_store %arg4[%c0_5, %c0_6], %6 {strides = array<i32>} : memref<8x128xf32, #tpu.memory_space<vmem>>, vector<8x128xf32>,
    return
  }
  func.func @transform_0(%arg0: i32) -> (i32, i32) {
    %c0_i32 = arith.constant 0 : i32
    %c0_i32_0 = arith.constant 0 : i32
    return %arg0, %c0_i32 : i32, i32
  }
  func.func @transform_1(%arg0: i32) -> (i32, i32) {
    %c0_i32 = arith.constant 0 : i32
    %c0_i32_0 = arith.constant 0 : i32
    %c0_i32_1 = arith.constant 0 : i32
    return %c0_i32, %c0_i32_0 : i32, i32
  }
  func.func @transform_2(%arg0: i32) -> (i32, i32) {
    %c0_i32 = arith.constant 0 : i32
    %c0_i32_0 = arith.constant 0 : i32
    %c0_i32_1 = arith.constant 0 : i32
    return %c0_i32, %c0_i32_0 : i32, i32
  }
  func.func @transform_3(%arg0: i32) -> (i32, i32) {
    %c0_i32 = arith.constant 0 : i32
    %c0_i32_0 = arith.constant 0 : i32
    return %arg0, %c0_i32 : i32, i32
  }
}

</mosaic_0001>

<bundles_post_ra>
// kernel: _fused_heads_pallas.1
= control target key start
LH: loop header
LB: loop body
LE: loop exit
PB: predicated region body
PF: predicated region fallthrough
CT: control target
= control target key end

     0   :  { %8 = vsyncpa [#allocation3], 0  ;;  %s257_s0 = inlined_call_operand.hbm [shape: f32[8,32], index: 0, kind: input, shape index: {}]   ;;  %s258_s1 = inlined_call_operand.hbm [shape: bf16[32,128], index: 1, kind: input, shape index: {}]   ;;  %s259_s2 = inlined_call_operand.vmem [shape: f32[1,128], index: 2, kind: input, shape index: {}]   ;;  %s260_s3 = inlined_call_operand.hbm [shape: f32[8,128], index: 3, kind: output, shape index: {}]  }
   0x1   :  { %9 = vsyncpa [#allocation6], 0 }
   0x2   :  { %10 = vsyncpa [#allocation4], 0  ;;  %s218_s12 = smov [#allocation2]   ;;  %s219_s14 = smov [#allocation5]  }
   0x3   :  { %s17_s13 = sshll.u32 %s218_s12, 4  ;;  %s26_s15 = sshll.u32 %s219_s14, 4  ;;  %s18_s13 = int_to_ptr.vmem [resolvable:$true] %s17_s13  ;;  %s27_s15 = int_to_ptr.vmem [resolvable:$true] %s26_s15 }
   0x4   :  { %s160_s16 = scalar_lea.vmem %s18_s13, 128  ;;  %p165_p1 = scmp.lt.s32.totalorder %s18_s13, %s18_s13 }
   0x5   :  { %p161_p0 = scmp.ne.s32.totalorder %s18_s13, %s160_s16  ;;  %p166_p2 = scmp.lt.s32.totalorder %s160_s16, %s160_s16 }
   0x7   :  { %p167_p3 = por %p166_p2, %p165_p1 }
   0x9   :  { %p168_p4 = pnand %p167_p3, %p161_p0 }
   0xb   :  { %171 = shalt.err (!%p168_p4)
}
   0xc   :  { %20 = dma.hbm_to_vmem [thread:$0]  %s257_s0, 128, %s18_s13, [#allocation3]  }
   0xd   :  { %s180_s19 = scalar_lea.vmem %s27_s15, 256  ;;  %p185_p6 = scmp.lt.s32.totalorder %s27_s15, %s27_s15 }
   0xe   :  { %p181_p5 = scmp.ne.s32.totalorder %s27_s15, %s180_s19  ;;  %p186_p7 = scmp.lt.s32.totalorder %s180_s19, %s180_s19 }
  0x10   :  { %p187_p8 = por %p186_p7, %p185_p6 }
  0x12   :  { %p188_p9 = pnand %p187_p8, %p181_p5 }
  0x14   :  { %191 = shalt.err (!%p188_p9)
}
  0x15   :  { %s220_s20 = smov 64   ;;  %s221_s21 = smov 4  }
  0x16   :  { %32 = dma.hbm_to_vmem [thread:$0]  %s258_s1, 256, %s27_s15, [#allocation6], %s220_s20, %s220_s20, %s221_s21  }
  0x17   :  { %212 = dma.done.wait [#allocation3], 128  }
  0x18   :  { %213 = vsyncadd [#allocation3], 4294967168 }
  0x19   :  { %214 = dma.done.wait [#allocation6], 256  }
  0x1a   :  { %215 = vsyncadd [#allocation6], 4294967040  ;;  %v222_v0 = vmov 0.0   ;;  %vm223_vm0 = vmmov 0   ;;  %v150_v1 = vld [vmem:[#allocation5 + $0x8] sm:$0xff]   ;;  %v151_v2 = vld [vmem:[#allocation5] sm:$0xff]  }
  0x1b   :  { %135 = vmatprep.subr.bf16.mxu0 %v222_v0  ;;  %139 = vmatprep.mubr.msk.bf16.mxu0 %vm223_vm0, %v222_v0  ;;  %v42_v3 = vld [vmem:[#allocation2] sm:$0xff]  ;;  %vm67_vm1 = vcmask 261120   ;;  %s224_s1 = smov [#allocation7]  }
  0x1c   :  { %136 = vmatpush3.bf16.msra.mxu0 %v150_v1  ;;  %v43_v4 = vpack.c.bf16 %v42_v3, %v42_v3  ;;  %v128_v5 = vld [vmem:[%s259_s2] ss:$0 sm:$0xff]  ;;  %s118_s25 = sshll.u32 %s224_s1, 4  ;;  %s119_s25 = int_to_ptr.vmem [resolvable:$true] %s118_s25 }
  0x1d   :  { %137 = vmatprep.subr.bf16.mxu0 %v222_v0  ;;  %s192_s26 = scalar_lea.vmem %s119_s25, 128  ;;  %p197_p11 = scmp.lt.s32.totalorder %s119_s25, %s119_s25 }
  0x1e   :  { %p193_p10 = scmp.ne.s32.totalorder %s119_s25, %s192_s26  ;;  %p198_p12 = scmp.lt.s32.totalorder %s192_s26, %s192_s26 }
  0x20   :  { %138 = vmatpush3.bf16.msra.mxu0 %v151_v2  ;;  %p199_p13 = por %p198_p12, %p197_p11 }
  0x22   :  { %p200_p0 = pnand %p199_p13, %p193_p10 }
  0x23   :  { %140 = vmatmul.mubr.msk.bf16.vlgmr.msra.gmra.mxu0 %vm67_vm1, %v43_v4 }
  0xe3   :  { %v105_v6 = vpop.f32.mrf.mxu0 }
  0xe4   :  { %v106_v7 = vadd.f32 %v128_v5, %v105_v6 }
  0xe5   :  { %v141_v8 = vpop.f32.mrf.mxu0 }
  0xe6   :  { %111 = vst [vmem:[#allocation7] sm:$0xff] %v106_v7 }
  0xe7   :  { %v108_v9 = vpop.f32.mrf.mxu0 }
  0xe8   :  { %203 = shalt.err (!%p200_p0)
}
  0xe9   :  { %121 = dma.vmem_to_hbm [thread:$0]  %s119_s25, 128, %s260_s3, [#allocation4]   ;;  %v142_v10 = vpop.f32.mrf.mxu0 }
  0xea   :  { %216 = dma.done.wait [#allocation4], 128  }
  0xeb   :  { %217 = vsyncadd [#allocation4], 4294967168 }
  0xec   :  { %125 = vsyncpa [#allocation3], 1 }
  0xed   :  { %126 = vsyncpa [#allocation6], 1 }
  0xee   :  { %127 = vsyncpa [#allocation4], 1 }

</bundles_post_ra>
